<compile_context>
chip_gen: v7x
topology: tpu7x:2x2x1
jax: 0.10.0
libtpu: 0.0.40
codegen_flags: <defaults>
</compile_context>

<pallas_src>
import functools

import jax
import jax.numpy as jnp
from jax.experimental import pallas as pl
from jax.experimental.pallas import tpu as pltpu


def _round_up(n, m):
    return ((n + m - 1) // m) * m


def _dddqn_kernel(x_ref, w_ref, b_ref, q_ref, *, state_size, sp, hp, ap):
    """One batch tile of the full DDDQN forward.

    x_ref: (TB, state_size)      un-padded input tile (f32)
    w_ref: (sp + 5*hp, 2*hp)     packed bf16 weights (resident across the grid)
    b_ref: (8, 2*hp)             packed f32 biases   (resident across the grid)
    q_ref: (TB, ap)              lane-dense padded Q output tile (f32)
    """
    f32 = jnp.float32
    bf16 = jnp.bfloat16

    x = x_ref[...]
    if state_size < sp:
        # Cheap in-register lane pad -> every matmul is 128-aligned; the padded
        # weight rows in the slab are zero so the result is unchanged.
        x = jnp.concatenate(
            [x, jnp.zeros((x.shape[0], sp - state_size), x.dtype)], axis=1)
    x = x.astype(bf16)

    # Static row offsets into the packed weight slab (all multiples of 128).
    r1 = sp            # W2
    r2 = sp + hp       # W3
    r3 = sp + 2 * hp   # fused head1 [Wvf | Waf]
    r4 = sp + 3 * hp   # folded head2 (2*hp rows)

    w1 = w_ref[0:sp, 0:hp]
    w2 = w_ref[r1:r1 + hp, 0:hp]
    w3 = w_ref[r2:r2 + hp, 0:hp]
    wh1 = w_ref[r3:r3 + hp, :]            # (hp, 2*hp)
    wh2 = w_ref[r4:r4 + 2 * hp, 0:ap]     # (2*hp, ap)

    b1 = b_ref[0:1, 0:hp]
    b2 = b_ref[1:2, 0:hp]
    b3 = b_ref[2:3, 0:hp]
    bh1 = b_ref[3:4, :]                   # (1, 2*hp)
    bh2 = b_ref[4:5, 0:ap]                # (1, ap)

    # Trunk: three Linear + ReLU layers (bf16 MXU matmuls, f32 accumulation,
    # f32 VPU bias add / ReLU).
    h = jnp.maximum(jnp.dot(x, w1, preferred_element_type=f32) + b1, 0.0)
    h = jnp.maximum(
        jnp.dot(h.astype(bf16), w2, preferred_element_type=f32) + b2, 0.0)
    h = jnp.maximum(
        jnp.dot(h.astype(bf16), w3, preferred_element_type=f32) + b3, 0.0)

    # Fused dueling heads.
    #   va lanes [0:hidden)        = ReLU(value_fc(h))
    #   va lanes [hidden:2*hidden) = ReLU(advantage_fc(h))
    va = jnp.maximum(
        jnp.dot(h.astype(bf16), wh1, preferred_element_type=f32) + bh1, 0.0)

    # The dueling combine V + (A - mean(A)) is folded into (wh2, bh2) at pack
    # time, so Q is a single matmul + bias with a lane-dense store.
    q_ref[...] = jnp.dot(va.astype(bf16), wh2, preferred_element_type=f32) + bh2


def pack_params(params, state_size, hidden_size, action_size):
    """Pack all 7 Linear layers into 2 padded contiguous buffers.

    Returns:
      w_packed: (sp + 5*hp, 2*hp) bf16 weight slab.
      b_packed: (8, 2*hp)         f32 bias slab.

    The dueling combine  Q = V + (A - mean(A))  is folded into the last band:
      Q_j = v.wv + a.(wa[:,j] - mean_k wa[:,k]) + (bv + ba[j] - mean(ba))
    so the kernel never builds masks or does cross-lane reductions.
    """
    f32 = jnp.float32
    sp = _round_up(state_size, 128)
    hp = _round_up(hidden_size, 128)
    ap = _round_up(action_size, 128)
    lw = 2 * hp
    assert ap <= lw, "action_size padding must fit in the packed lane width"
    assert 2 * hidden_size <= lw

    def band(mat, rows):
        mat = mat.astype(f32)
        return jnp.pad(mat, ((0, rows - mat.shape[0]), (0, lw - mat.shape[1])))

    # Fused head1 weight: [Wvf | Waf] along the output-lane axis.
    wh1 = jnp.concatenate(
        [params["wvf"].astype(f32), params["waf"].astype(f32)], axis=1)

    # Folded head2: value column replicated into every action lane, advantage
    # weights centered over the action axis (built in f32, cast at the end).
    wa = params["wa"].astype(f32)
    wa_c = wa - jnp.mean(wa, axis=1, keepdims=True)
    wv_rep = jnp.broadcast_to(params["wv"].astype(f32),
                              (hidden_size, action_size))
    wh2 = jnp.zeros((2 * hp, ap), f32)
    wh2 = wh2.at[0:hidden_size, 0:action_size].set(wv_rep)
    wh2 = wh2.at[hidden_size:2 * hidden_size, 0:action_size].set(wa_c)

    w_packed = jnp.concatenate(
        [
            band(params["w1"], sp),
            band(params["w2"], hp),
            band(params["w3"], hp),
            band(wh1, hp),
            band(wh2, 2 * hp),
        ],
        axis=0,
    ).astype(jnp.bfloat16)                      # (sp + 5*hp, 2*hp)

    ba = params["ba"].astype(f32)
    bh2 = params["bv"].astype(f32)[0] + ba - jnp.mean(ba)

    b_packed = jnp.zeros((8, lw), f32)
    b_packed = b_packed.at[0, :hidden_size].set(params["b1"])
    b_packed = b_packed.at[1, :hidden_size].set(params["b2"])
    b_packed = b_packed.at[2, :hidden_size].set(params["b3"])
    b_packed = b_packed.at[3, :hidden_size].set(params["bvf"])
    b_packed = b_packed.at[3, hidden_size:2 * hidden_size].set(params["baf"])
    b_packed = b_packed.at[4, :action_size].set(bh2)
    return w_packed, b_packed


def dddqn_forward(x, w_packed, b_packed, *, state_size, hidden_size, action_size,
                  block_batch=512):
    """DDDQNNet forward: x (batch, state_size) -> Q (batch, action_size)."""
    sp = _round_up(state_size, 128)
    hp = _round_up(hidden_size, 128)
    ap = _round_up(action_size, 128)
    assert w_packed.shape == (sp + 5 * hp, 2 * hp), w_packed.shape
    assert b_packed.shape == (8, 2 * hp), b_packed.shape
    assert x.shape[1] == state_size

    batch = x.shape[0]
    # Batch tile: big to amortize the ~0.35us per-grid-step overhead, capped at
    # ~ceil(batch/2) so moderate batches still yield >=2 "parallel" grid steps
    # (keeps both v7x TensorCores busy).  Sweep block_batch {512,1024,2048}.
    half = _round_up(max(pl.cdiv(batch, 2), 1), 8)
    tb = max(8, min(block_batch, half))
    b_pad = _round_up(batch, tb)

    x_p = x.astype(jnp.float32)
    if b_pad != batch:
        x_p = jnp.pad(x_p, ((0, b_pad - batch), (0, 0)))

    kernel = functools.partial(
        _dddqn_kernel, state_size=state_size, sp=sp, hp=hp, ap=ap)

    # VMEM budget from the actual buffers (+ activation headroom), clamped to a
    # value that is valid on v5e/v6e/v7x.  Note: the resident weight slab is
    # bf16, which halves its footprint; pl.Buffered(1) on the constant-index
    # weight spec would halve it again if ever VMEM-tight on v7x.
    w_bytes = w_packed.size * w_packed.dtype.itemsize
    b_bytes = b_packed.size * b_packed.dtype.itemsize
    x_tile_bytes = tb * state_size * 4
    q_tile_bytes = tb * ap * 4
    act_bytes = 6 * tb * 2 * hp * 4
    vmem_bytes = int(2 * (w_bytes + b_bytes + x_tile_bytes + q_tile_bytes)
                     + act_bytes)
    vmem_bytes = min(max(vmem_bytes, 8 * 1024 * 1024), 64 * 1024 * 1024)

    flops = 2 * b_pad * (sp * hp + 2 * hp * hp + hp * (2 * hp) + 2 * hp * ap)
    bytes_accessed = x_p.size * 4 + w_bytes + b_bytes + b_pad * ap * 4

    q_pad = pl.pallas_call(
        kernel,
        out_shape=jax.ShapeDtypeStruct((b_pad, ap), jnp.float32),
        grid=(b_pad // tb,),
        in_specs=[
            pl.BlockSpec((tb, state_size), lambda i: (i, 0)),   # batch-tiled x
            pl.BlockSpec(w_packed.shape, lambda i: (0, 0)),     # resident weights
            pl.BlockSpec(b_packed.shape, lambda i: (0, 0)),     # resident biases
        ],
        out_specs=pl.BlockSpec((tb, ap), lambda i: (i, 0)),     # lane-dense Q slab
        compiler_params=pltpu.CompilerParams(
            dimension_semantics=("parallel",),                  # megacore on v7x
            vmem_limit_bytes=vmem_bytes),
        cost_estimate=pl.CostEstimate(
            flops=flops, transcendentals=0, bytes_accessed=bytes_accessed),
    )(x_p, w_packed, b_packed)

    return q_pad[:batch, :action_size]


def init_params(key, state_size, hidden_size, action_size):
    """PyTorch-style uniform(+-1/sqrt(fan_in)) init; weights stored (in, out)."""
    def linear_init(key, fan_in, fan_out):
        kw, kb = jax.random.split(key)
        bound = 1.0 / jnp.sqrt(jnp.float32(fan_in))
        w = jax.random.uniform(kw, (fan_in, fan_out), jnp.float32, -bound, bound)
        b = jax.random.uniform(kb, (fan_out,), jnp.float32, -bound, bound)
        return w, b

    keys = jax.random.split(key, 7)
    params = {}
    params["w1"], params["b1"] = linear_init(keys[0], state_size, hidden_size)
    params["w2"], params["b2"] = linear_init(keys[1], hidden_size, hidden_size)
    params["w3"], params["b3"] = linear_init(keys[2], hidden_size, hidden_size)
    params["wvf"], params["bvf"] = linear_init(keys[3], hidden_size, hidden_size)
    params["wv"], params["bv"] = linear_init(keys[4], hidden_size, 1)
    params["waf"], params["baf"] = linear_init(keys[5], hidden_size, hidden_size)
    params["wa"], params["ba"] = linear_init(keys[6], hidden_size, action_size)
    return params


def reference_forward(x, params):
    """Pure-JAX f32 reference of the PyTorch forward, for verification."""
    h = jax.nn.relu(x @ params["w1"] + params["b1"])
    h = jax.nn.relu(h @ params["w2"] + params["b2"])
    h = jax.nn.relu(h @ params["w3"] + params["b3"])
    v = jax.nn.relu(h @ params["wvf"] + params["bvf"])
    value = v @ params["wv"] + params["bv"]
    a = jax.nn.relu(h @ params["waf"] + params["baf"])
    advantage = a @ params["wa"] + params["ba"]
    return value + (advantage - advantage.mean(axis=1, keepdims=True))


if __name__ == "__main__":
    batch = 2
    state_size = 8
    hidden_size = 32
    action_size = 4

    key = jax.random.PRNGKey(0)
    kx, kp = jax.random.split(key)

    x = jax.random.normal(kx, (batch, state_size), jnp.float32)
    params = init_params(kp, state_size, hidden_size, action_size)
    w_packed, b_packed = pack_params(params, state_size, hidden_size, action_size)

    q = dddqn_forward(
        x, w_packed, b_packed,
        state_size=state_size, hidden_size=hidden_size, action_size=action_size)
    q = jax.block_until_ready(q)

    q_ref = reference_forward(x, params)
    assert q.shape == (batch, action_size)
    # bf16 weights with f32 accumulation: tolerance loosened accordingly.
    assert jnp.allclose(q, q_ref, atol=2e-2, rtol=2e-2), (q, q_ref)

    print("KERNEL_OK")
</pallas_src>

<mosaic_0001>
module attributes {stable_mosaic.version = 11 : i64} {
  func.func @_dddqn_kernel(%arg0: i32, %arg1: memref<8x8xf32, #tpu.memory_space<vmem>>, %arg2: memref<768x256xbf16, #tpu.memory_space<vmem>>, %arg3: memref<8x256xf32, #tpu.memory_space<vmem>>, %arg4: memref<8x128xf32, #tpu.memory_space<vmem>>) attributes {dimension_semantics = [#tpu.dimension_semantics<parallel>], iteration_bounds = array<i64: 1>, scalar_prefetch = 0 : i64, scratch_operands = 0 : i64, tpu.core_type = #tpu.core_type<tc>, window_params = [{transform_indices = @transform_0, window_bounds = array<i64: 8, 8>}, {pipeline_mode = #tpu.pipeline_mode<synchronous>, transform_indices = @transform_1, window_bounds = array<i64: 768, 256>}, {pipeline_mode = #tpu.pipeline_mode<synchronous>, transform_indices = @transform_2, window_bounds = array<i64: 8, 256>}, {transform_indices = @transform_3, window_bounds = array<i64: 8, 128>}]} {
    %c0 = arith.constant 0 : index
    %c0_0 = arith.constant 0 : index
    %0 = vector.load %arg1[%c0, %c0_0] : memref<8x8xf32, #tpu.memory_space<vmem>>, vector<8x8xf32>
    %cst = arith.constant 0.000000e+00 : f32
    %1 = vector.broadcast %cst : f32 to vector<8x120xf32>
    %2 = tpu.concatenate %0, %1 in 1 : vector<8x8xf32>, vector<8x120xf32> -> vector<8x128xf32>
    %3 = arith.truncf %2 : vector<8x128xf32> to vector<8x128xbf16>
    %c0_1 = arith.constant 0 : index
    %c0_2 = arith.constant 0 : index
    %4 = vector.load %arg2[%c0_1, %c0_2] : memref<768x256xbf16, #tpu.memory_space<vmem>>, vector<128x128xbf16>
    %c128 = arith.constant 128 : index
    %c0_3 = arith.constant 0 : index
    %5 = vector.load %arg2[%c128, %c0_3] : memref<768x256xbf16, #tpu.memory_space<vmem>>, vector<128x128xbf16>
    %c256 = arith.constant 256 : index
    %c0_4 = arith.constant 0 : index
    %6 = vector.load %arg2[%c256, %c0_4] : memref<768x256xbf16, #tpu.memory_space<vmem>>, vector<128x128xbf16>
    %c384 = arith.constant 384 : index
    %c0_5 = arith.constant 0 : index
    %7 = vector.load %arg2[%c384, %c0_5] : memref<768x256xbf16, #tpu.memory_space<vmem>>, vector<128x256xbf16>
    %c512 = arith.constant 512 : index
    %c0_6 = arith.constant 0 : index
    %8 = vector.load %arg2[%c512, %c0_6] : memref<768x256xbf16, #tpu.memory_space<vmem>>, vector<256x128xbf16>
    %c0_7 = arith.constant 0 : index
    %c0_8 = arith.constant 0 : index
    %9 = vector.load %arg3[%c0_7, %c0_8] : memref<8x256xf32, #tpu.memory_space<vmem>>, vector<1x128xf32>
    %c1 = arith.constant 1 : index
    %c0_9 = arith.constant 0 : index
    %10 = vector.load %arg3[%c1, %c0_9] : memref<8x256xf32, #tpu.memory_space<vmem>>, vector<1x128xf32>
    %c2 = arith.constant 2 : index
    %c0_10 = arith.constant 0 : index
    %11 = vector.load %arg3[%c2, %c0_10] : memref<8x256xf32, #tpu.memory_space<vmem>>, vector<1x128xf32>
    %c3 = arith.constant 3 : index
    %c0_11 = arith.constant 0 : index
    %12 = vector.load %arg3[%c3, %c0_11] : memref<8x256xf32, #tpu.memory_space<vmem>>, vector<1x256xf32>
    %c4 = arith.constant 4 : index
    %c0_12 = arith.constant 0 : index
    %13 = vector.load %arg3[%c4, %c0_12] : memref<8x256xf32, #tpu.memory_space<vmem>>, vector<1x128xf32>
    %cst_13 = arith.constant dense<0.000000e+00> : vector<8x128xf32>
    %14 = tpu.matmul %3, %4, %cst_13 {dimension_numbers = #tpu.dot_dimension_numbers<[1], [0], [0], [1], [0, 0, 1, 1], [], []>} : vector<8x128xbf16>, vector<128x128xbf16>, vector<8x128xf32> -> vector<8x128xf32>
    %15 = vector.broadcast %9 : vector<1x128xf32> to vector<8x128xf32>
    %16 = arith.addf %14, %15 : vector<8x128xf32>
    %cst_14 = arith.constant 0.000000e+00 : f32
    %17 = vector.broadcast %cst_14 : f32 to vector<8x128xf32>
    %18 = arith.maximumf %16, %17 : vector<8x128xf32>
    %19 = arith.truncf %18 : vector<8x128xf32> to vector<8x128xbf16>
    %cst_15 = arith.constant dense<0.000000e+00> : vector<8x128xf32>
    %20 = tpu.matmul %19, %5, %cst_15 {dimension_numbers = #tpu.dot_dimension_numbers<[1], [0], [0], [1], [0, 0, 1, 1], [], []>} : vector<8x128xbf16>, vector<128x128xbf16>, vector<8x128xf32> -> vector<8x128xf32>
    %21 = vector.broadcast %10 : vector<1x128xf32> to vector<8x128xf32>
    %22 = arith.addf %20, %21 : vector<8x128xf32>
    %cst_16 = arith.constant 0.000000e+00 : f32
    %23 = vector.broadcast %cst_16 : f32 to vector<8x128xf32>
    %24 = arith.maximumf %22, %23 : vector<8x128xf32>
    %25 = arith.truncf %24 : vector<8x128xf32> to vector<8x128xbf16>
    %cst_17 = arith.constant dense<0.000000e+00> : vector<8x128xf32>
    %26 = tpu.matmul %25, %6, %cst_17 {dimension_numbers = #tpu.dot_dimension_numbers<[1], [0], [0], [1], [0, 0, 1, 1], [], []>} : vector<8x128xbf16>, vector<128x128xbf16>, vector<8x128xf32> -> vector<8x128xf32>
    %27 = vector.broadcast %11 : vector<1x128xf32> to vector<8x128xf32>
    %28 = arith.addf %26, %27 : vector<8x128xf32>
    %cst_18 = arith.constant 0.000000e+00 : f32
    %29 = vector.broadcast %cst_18 : f32 to vector<8x128xf32>
    %30 = arith.maximumf %28, %29 : vector<8x128xf32>
    %31 = arith.truncf %30 : vector<8x128xf32> to vector<8x128xbf16>
    %cst_19 = arith.constant dense<0.000000e+00> : vector<8x256xf32>
    %32 = tpu.matmul %31, %7, %cst_19 {dimension_numbers = #tpu.dot_dimension_numbers<[1], [0], [0], [1], [0, 0, 1, 1], [], []>} : vector<8x128xbf16>, vector<128x256xbf16>, vector<8x256xf32> -> vector<8x256xf32>
    %33 = vector.broadcast %12 : vector<1x256xf32> to vector<8x256xf32>
    %34 = arith.addf %32, %33 : vector<8x256xf32>
    %cst_20 = arith.constant 0.000000e+00 : f32
    %35 = vector.broadcast %cst_20 : f32 to vector<8x256xf32>
    %36 = arith.maximumf %34, %35 : vector<8x256xf32>
    %37 = arith.truncf %36 : vector<8x256xf32> to vector<8x256xbf16>
    %cst_21 = arith.constant dense<0.000000e+00> : vector<8x128xf32>
    %38 = tpu.matmul %37, %8, %cst_21 {dimension_numbers = #tpu.dot_dimension_numbers<[1], [0], [0], [1], [0, 0, 1, 1], [], []>} : vector<8x256xbf16>, vector<256x128xbf16>, vector<8x128xf32> -> vector<8x128xf32>
    %39 = vector.broadcast %13 : vector<1x128xf32> to vector<8x128xf32>
    %40 = arith.addf %38, %39 : vector<8x128xf32>
    %c0_22 = arith.constant 0 : index
    %c0_23 = arith.constant 0 : index
    %41 = vector.load %arg4[%c0_22, %c0_23] : memref<8x128xf32, #tpu.memory_space<vmem>>, vector<8x128xf32>
    tpu.vector_store %arg4[%c0_22, %c0_23], %40 {strides = array<i32>} : memref<8x128xf32, #tpu.memory_space<vmem>>, vector<8x128xf32>,
    return
  }
  func.func @transform_0(%arg0: i32) -> (i32, i32) {
    %c0_i32 = arith.constant 0 : i32
    %c0_i32_0 = arith.constant 0 : i32
    return %arg0, %c0_i32 : i32, i32
  }
  func.func @transform_1(%arg0: i32) -> (i32, i32) {
    %c0_i32 = arith.constant 0 : i32
    %c0_i32_0 = arith.constant 0 : i32
    %c0_i32_1 = arith.constant 0 : i32
    return %c0_i32, %c0_i32_0 : i32, i32
  }
  func.func @transform_2(%arg0: i32) -> (i32, i32) {
    %c0_i32 = arith.constant 0 : i32
    %c0_i32_0 = arith.constant 0 : i32
    %c0_i32_1 = arith.constant 0 : i32
    return %c0_i32, %c0_i32_0 : i32, i32
  }
  func.func @transform_3(%arg0: i32) -> (i32, i32) {
    %c0_i32 = arith.constant 0 : i32
    %c0_i32_0 = arith.constant 0 : i32
    return %arg0, %c0_i32 : i32, i32
  }
}

</mosaic_0001>

<bundles_post_ra>
// kernel: tpu_custom_call.1
= control target key start
LH: loop header
LB: loop body
LE: loop exit
PB: predicated region body
PF: predicated region fallthrough
CT: control target
= control target key end

     0   :  { %8 = vsyncpa [#allocation3], 0  ;;  %s1168_s0 = inlined_call_operand.hbm [shape: f32[8,8], index: 0, kind: input, shape index: {}]   ;;  %s1169_s1 = inlined_call_operand.hbm [shape: bf16[768,256], index: 1, kind: input, shape index: {}]   ;;  %s1170_s2 = inlined_call_operand.hbm [shape: f32[8,256], index: 2, kind: input, shape index: {}]   ;;  %s1171_s3 = inlined_call_operand.hbm [shape: f32[8,128], index: 3, kind: output, shape index: {}]  }
   0x1   :  { %9 = vsyncpa [#allocation6], 0 }
   0x2   :  { %10 = vsyncpa [#allocation4], 0  ;;  %s1053_s12 = smov [#allocation5]   ;;  %s959_s16 = scalar_lea.hbm %s1169_s1, 12288 }
   0x3   :  { %s26_s13 = sshll.u32 %s1053_s12, 4  ;;  %p960_p0 = scmp.ne.s32.totalorder %s1169_s1, %s959_s16  ;;  %s27_s13 = int_to_ptr.vmem [resolvable:$true] %s26_s13 }
   0x4   :  { %p963_p1 = scmp.lt.u32.totalorder %s959_s16, %s1169_s1 }
   0x6   :  { %p965_p2 = pnand %p963_p1, %p960_p0 }
   0x8   :  { %968 = shalt.err (!%p965_p2)
}
   0x9   :  { %s969_s21 = scalar_lea.vmem %s27_s13, 12288  ;;  %p974_p4 = scmp.lt.s32.totalorder %s27_s13, %s27_s13 }
   0xa   :  { %p970_p3 = scmp.ne.s32.totalorder %s27_s13, %s969_s21  ;;  %p975_p5 = scmp.lt.s32.totalorder %s969_s21, %s969_s21 }
   0xc   :  { %p976_p6 = por %p975_p5, %p974_p4 }
   0xe   :  { %p977_p7 = pnand %p976_p6, %p970_p3 }
  0x10   :  { %980 = shalt.err (!%p977_p7)
}
  0x11   :  { %s1054_s22 = smov 128   ;;  %s1055_s23 = smov 8  }
  0x12   :  { %32 = dma.hbm_to_vmem [thread:$0]  %s1169_s1, 12288, %s27_s13, [#allocation6], %s1054_s22, %s1054_s22, %s1055_s23  }
  0x13   :  { %s1056_s26 = smov [#allocation2]   ;;  %s1057_s28 = smov [#allocation7]  }
  0x14   :  { %s17_s27 = sshll.u32 %s1056_s26, 4  ;;  %s39_s29 = sshll.u32 %s1057_s28, 4  ;;  %s18_s27 = int_to_ptr.vmem [resolvable:$true] %s17_s27  ;;  %s40_s29 = int_to_ptr.vmem [resolvable:$true] %s39_s29 }
  0x15   :  { %s981_s5 = scalar_lea.hbm %s1168_s0, 128 }
  0x16   :  { %p982_p8 = scmp.ne.s32.totalorder %s1168_s0, %s981_s5  ;;  %p985_p9 = scmp.lt.u32.totalorder %s981_s5, %s1168_s0 }
  0x18   :  { %p987_p10 = pnand %p985_p9, %p982_p8 }
  0x1a   :  { %990 = shalt.err (!%p987_p10)
}
  0x1b   :  { %s991_s1 = scalar_lea.vmem %s18_s27, 128  ;;  %p996_p12 = scmp.lt.s32.totalorder %s18_s27, %s18_s27 }
  0x1c   :  { %p992_p11 = scmp.ne.s32.totalorder %s18_s27, %s991_s1  ;;  %p997_p13 = scmp.lt.s32.totalorder %s991_s1, %s991_s1 }
  0x1e   :  { %p998_p0 = por %p997_p13, %p996_p12 }
  0x20   :  { %p999_p1 = pnand %p998_p0, %p992_p11 }
  0x22   :  { %1002 = shalt.err (!%p999_p1)
}
  0x23   :  { %20 = dma.hbm_to_vmem [thread:$0]  %s1168_s0, 128, %s18_s27, [#allocation3]  }
  0x24   :  { %s1003_s14 = scalar_lea.hbm %s1170_s2, 256 }
  0x25   :  { %p1004_p2 = scmp.ne.s32.totalorder %s1170_s2, %s1003_s14  ;;  %p1007_p3 = scmp.lt.u32.totalorder %s1003_s14, %s1170_s2 }
  0x27   :  { %p1009_p4 = pnand %p1007_p3, %p1004_p2 }
  0x29   :  { %1012 = shalt.err (!%p1009_p4)
}
  0x2a   :  { %s1013_s19 = scalar_lea.vmem %s40_s29, 256  ;;  %p1018_p6 = scmp.lt.s32.totalorder %s40_s29, %s40_s29 }
  0x2b   :  { %p1014_p5 = scmp.ne.s32.totalorder %s40_s29, %s1013_s19  ;;  %p1019_p7 = scmp.lt.s32.totalorder %s1013_s19, %s1013_s19 }
  0x2d   :  { %p1020_p8 = por %p1019_p7, %p1018_p6 }
  0x2f   :  { %p1021_p9 = pnand %p1020_p8, %p1014_p5 }
  0x31   :  { %1024 = shalt.err (!%p1021_p9)
}
  0x32   :  { %42 = dma.hbm_to_vmem [thread:$0]  %s1170_s2, 256, %s40_s29, [#allocation6]  }
  0x33   :  { %1047 = dma.done.wait [#allocation3], 128  }
  0x34   :  { %1048 = vsyncadd [#allocation3], 4294967168 }
  0x35   :  { %1049 = dma.done.wait [#allocation6], 12544  }
  0x36   :  { %1050 = vsyncadd [#allocation6], 4294954752  ;;  %v1058_v0 = vmov 0.0   ;;  %vm1059_vm0 = vmmov 0   ;;  %v895_v1 = vld [vmem:[#allocation5] ss:$8 sps:$4 sm:$0xff]  }
  0x37   :  { %826 = vmatprep.subr.bf16.mxu0 %v1058_v0  ;;  %842 = vmatprep.mubr.msk.bf16.mxu0 %vm1059_vm0, %v1058_v0  ;;  %v896_v2 = vld [vmem:[#allocation5 + $0x10] ss:$8 sps:$4 sm:$0xff]   ;;  %v897_v3 = vld [vmem:[#allocation5 + $0x20] ss:$8 sps:$4 sm:$0xff]   ;;  %vm54_vm1 = vcmask 64512   ;;  %v1060_v60 = vmov 0  }
  0x38   :  { %846 = vmatprep.subr.bf16.mxu1 %v1058_v0  ;;  %862 = vmatprep.mubr.msk.bf16.mxu1 %vm1059_vm0, %v1058_v0  ;;  %v903_v4 = vld [vmem:[#allocation5 + $0x80] ss:$8 sps:$4 sm:$0xff]   ;;  %v898_v5 = vld [vmem:[#allocation5 + $0x30] ss:$8 sps:$4 sm:$0xff]   ;;  %vm1134_vm2 = vmpackc.low %vm54_vm1, %vm54_vm1  ;;  %s1061_s2 = smov [#allocation8]  }
  0x39   :  { %827 = vmatpush3.bf16.msra.mxu0 %v895_v1  ;;  %847 = vmatpush3.bf16.msra.mxu1 %v903_v4  ;;  %v904_v6 = vld [vmem:[#allocation5 + $0x90] ss:$8 sps:$4 sm:$0xff]   ;;  %v899_v7 = vld [vmem:[#allocation5 + $0x40] ss:$8 sps:$4 sm:$0xff]   ;;  %v921_v37 = vld [vmem:[#allocation5 + $0x184] ss:$8 sps:$4 sm:$0xff]  }
  0x3a   :  { %828 = vmatprep.subr.bf16.mxu0 %v1058_v0  ;;  %848 = vmatprep.subr.bf16.mxu1 %v1058_v0  ;;  %v905_v8 = vld [vmem:[#allocation5 + $0xa0] ss:$8 sps:$4 sm:$0xff]   ;;  %v900_v9 = vld [vmem:[#allocation5 + $0x50] ss:$8 sps:$4 sm:$0xff]   ;;  %v924_v38 = vld [vmem:[#allocation5 + $0x194] ss:$8 sps:$4 sm:$0xff]  }
  0x3b   :  { %v906_v10 = vld [vmem:[#allocation5 + $0xb0] ss:$8 sps:$4 sm:$0xff]   ;;  %v901_v11 = vld [vmem:[#allocation5 + $0x60] ss:$8 sps:$4 sm:$0xff]   ;;  %v927_v40 = vld [vmem:[#allocation5 + $0x1a4] ss:$8 sps:$4 sm:$0xff]  }
  0x3c   :  { %v907_v12 = vld [vmem:[#allocation5 + $0xc0] ss:$8 sps:$4 sm:$0xff]   ;;  %v902_v14 = vld [vmem:[#allocation5 + $0x70] ss:$8 sps:$4 sm:$0xff]   ;;  %v930_v42 = vld [vmem:[#allocation5 + $0x1b4] ss:$8 sps:$4 sm:$0xff]  }
  0x3d   :  { %829 = vmatpush3.bf16.msra.mxu0 %v896_v2  ;;  %849 = vmatpush3.bf16.msra.mxu1 %v904_v6  ;;  %v53_v15 = vld [vmem:[#allocation2] sm:$0xff]  ;;  %v909_v18 = vld [vmem:[#allocation5 + $0xe0] ss:$8 sps:$4 sm:$0xff]   ;;  %v933_v44 = vld [vmem:[#allocation5 + $0x1c4] ss:$8 sps:$4 sm:$0xff]   ;;  %s708_s21 = sshll.u32 %s1061_s2, 4  ;;  %s709_s21 = int_to_ptr.vmem [resolvable:$true] %s708_s21 }
  0x3e   :  { %830 = vmatprep.subr.bf16.mxu0 %v1058_v0  ;;  %850 = vmatprep.subr.bf16.mxu1 %v1058_v0  ;;  %v908_v16 = vld [vmem:[#allocation5 + $0xd0] ss:$8 sps:$4 sm:$0xff]   ;;  %v727_v17 = vpack.c.bf16 %v53_v15, %v53_v15  ;;  %v911_v20 = vld [vmem:[#allocation5 + $0x100] ss:$8 sps:$4 sm:$0xff]   ;;  %v936_v46 = vld [vmem:[#allocation5 + $0x1d4] ss:$8 sps:$4 sm:$0xff]   ;;  %p1030_p11 = scmp.lt.s32.totalorder %s709_s21, %s709_s21 }
  0x3f   :  { %v910_v19 = vld [vmem:[#allocation5 + $0xf0] ss:$8 sps:$4 sm:$0xff]   ;;  %v913_v22 = vld [vmem:[#allocation5 + $0x120] ss:$8 sps:$4 sm:$0xff]   ;;  %v939_v48 = vld [vmem:[#allocation5 + $0x1e4] ss:$8 sps:$4 sm:$0xff]  }
  0x40   :  { %v912_v21 = vld [vmem:[#allocation5 + $0x110] ss:$8 sps:$4 sm:$0xff]   ;;  %v915_v24 = vld [vmem:[#allocation5 + $0x140] ss:$8 sps:$4 sm:$0xff]   ;;  %v942_v58 = vld [vmem:[#allocation5 + $0x1f4] ss:$8 sps:$4 sm:$0xff]  }
  0x41   :  { %831 = vmatpush3.bf16.msra.mxu0 %v897_v3  ;;  %851 = vmatpush3.bf16.msra.mxu1 %v905_v8  ;;  %v914_v23 = vld [vmem:[#allocation5 + $0x130] ss:$8 sps:$4 sm:$0xff]   ;;  %v153_v26 = vld [vmem:[#allocation7] ss:$0 sm:$0xff]  ;;  %v154_v50 = vld [vmem:[#allocation7 + $0x1] ss:$0 sm:$0xff] }
  0x42   :  { %832 = vmatprep.subr.bf16.mxu0 %v1058_v0  ;;  %852 = vmatprep.subr.bf16.mxu1 %v1058_v0  ;;  %v916_v25 = vld [vmem:[#allocation5 + $0x150] ss:$8 sps:$4 sm:$0xff]   ;;  %v917_v34 = vld [vmem:[#allocation5 + $0x160] ss:$8 sps:$4 sm:$0xff]   ;;  %s1025_s22 = scalar_lea.vmem %s709_s21, 128 }
  0x43   :  { %v918_v35 = vld [vmem:[#allocation5 + $0x170] ss:$8 sps:$4 sm:$0xff]   ;;  %v919_v36 = vld [vmem:[#allocation5 + $0x180] ss:$8 sps:$4 sm:$0xff]   ;;  %p1026_p10 = scmp.ne.s32.totalorder %s709_s21, %s1025_s22  ;;  %p1031_p12 = scmp.lt.s32.totalorder %s1025_s22, %s1025_s22 }
  0x44   :  { %v922_v39 = vld [vmem:[#allocation5 + $0x190] ss:$8 sps:$4 sm:$0xff]   ;;  %v925_v41 = vld [vmem:[#allocation5 + $0x1a0] ss:$8 sps:$4 sm:$0xff]  }
  0x45   :  { %833 = vmatpush3.bf16.msra.mxu0 %v898_v5  ;;  %853 = vmatpush3.bf16.msra.mxu1 %v906_v10  ;;  %v928_v43 = vld [vmem:[#allocation5 + $0x1b0] ss:$8 sps:$4 sm:$0xff]   ;;  %v931_v45 = vld [vmem:[#allocation5 + $0x1c0] ss:$8 sps:$4 sm:$0xff]   ;;  %p1032_p13 = por %p1031_p12, %p1030_p11 }
  0x46   :  { %834 = vmatprep.subr.bf16.mxu0 %v1058_v0  ;;  %854 = vmatprep.subr.bf16.mxu1 %v1058_v0  ;;  %v934_v47 = vld [vmem:[#allocation5 + $0x1d0] ss:$8 sps:$4 sm:$0xff]   ;;  %v937_v49 = vld [vmem:[#allocation5 + $0x1e0] ss:$8 sps:$4 sm:$0xff]  }
  0x47   :  { %v940_v59 = vld [vmem:[#allocation5 + $0x1f0] ss:$8 sps:$4 sm:$0xff]   ;;  %v943_v61 = vld [vmem:[#allocation5 + $0x280] ss:$8 sps:$4 sm:$0xff]   ;;  %p1033_p0 = pnand %p1032_p13, %p1026_p10 }
  0x48   :  { %v944_v62 = vld [vmem:[#allocation5 + $0x200] ss:$8 sps:$4 sm:$0xff]   ;;  %v945_v63 = vld [vmem:[#allocation5 + $0x290] ss:$8 sps:$4 sm:$0xff]  }
  0x49   :  { %835 = vmatpush3.bf16.msra.mxu0 %v899_v7  ;;  %855 = vmatpush3.bf16.msra.mxu1 %v907_v12  ;;  %v947_v1 = vld [vmem:[#allocation5 + $0x2a0] ss:$8 sps:$4 sm:$0xff]   ;;  %v949_v3 = vld [vmem:[#allocation5 + $0x2b0] ss:$8 sps:$4 sm:$0xff]  }
  0x4a   :  { %836 = vmatprep.subr.bf16.mxu0 %v1058_v0  ;;  %856 = vmatprep.subr.bf16.mxu1 %v1058_v0  ;;  %v948_v2 = vld [vmem:[#allocation5 + $0x220] ss:$8 sps:$4 sm:$0xff]   ;;  %v950_v4 = vld [vmem:[#allocation5 + $0x230] ss:$8 sps:$4 sm:$0xff]  }
  0x4b   :  { %v951_v5 = vld [vmem:[#allocation5 + $0x2c0] ss:$8 sps:$4 sm:$0xff]   ;;  %v953_v7 = vld [vmem:[#allocation5 + $0x2d0] ss:$8 sps:$4 sm:$0xff]  }
  0x4c   :  { %v952_v6 = vld [vmem:[#allocation5 + $0x240] ss:$8 sps:$4 sm:$0xff]   ;;  %v954_v8 = vld [vmem:[#allocation5 + $0x250] ss:$8 sps:$4 sm:$0xff]  }
  0x4d   :  { %837 = vmatpush3.bf16.msra.mxu0 %v900_v9  ;;  %857 = vmatpush3.bf16.msra.mxu1 %v908_v16  ;;  %v155_v9 = vld [vmem:[#allocation7 + $0x2] ss:$0 sm:$0xff] }
  0x4e   :  { %838 = vmatprep.subr.bf16.mxu0 %v1058_v0  ;;  %858 = vmatprep.subr.bf16.mxu1 %v1058_v0 }
  0x51   :  { %839 = vmatpush3.bf16.msra.mxu0 %v901_v11  ;;  %859 = vmatpush3.bf16.msra.mxu1 %v909_v18  ;;  %v956_v18 = vld [vmem:[#allocation5 + $0x260] ss:$8 sps:$4 sm:$0xff]  }
  0x52   :  { %840 = vmatprep.subr.bf16.mxu0 %v1058_v0  ;;  %860 = vmatprep.subr.bf16.mxu1 %v1058_v0 }
  0x55   :  { %841 = vmatpush3.bf16.msra.mxu0 %v902_v14  ;;  %861 = vmatpush3.bf16.msra.mxu1 %v910_v19  ;;  %v957_v19 = vld [vmem:[#allocation5 + $0x2f0] ss:$8 sps:$4 sm:$0xff]  }
  0x56   :  { %866 = vmatprep.subr.bf16.mxu0 %v1058_v0  ;;  %520 = vmatprep.subr.bf16.mxu1 %v921_v37 }
  0x58   :  { %843 = vmatmul.mubr.msk.bf16.vlgmr.msra.gmra.mrb[0].mxu0 %vm1134_vm2, %v727_v17  ;;  %v955_v17 = vld [vmem:[#allocation5 + $0x2e0] ss:$8 sps:$4 sm:$0xff]  }
  0x59   :  { %882 = vmatprep.mubr.msk.bf16.mxu0 %vm1059_vm0, %v1058_v0  ;;  %867 = vmatpush3.bf16.msra.mxu0 %v911_v20  ;;  %v958_v20 = vld [vmem:[#allocation5 + $0x270] ss:$8 sps:$4 sm:$0xff]  }
  0x5a   :  { %868 = vmatprep.subr.bf16.mxu0 %v1058_v0 }
  0x5d   :  { %869 = vmatpush3.bf16.msra.mxu0 %v912_v21  ;;  %v430_v21 = vlaneseq }
  0x5e   :  { %870 = vmatprep.subr.bf16.mxu0 %v1058_v0 }
  0x61   :  { %871 = vmatpush3.bf16.msra.mxu0 %v913_v22  ;;  %v431_v22 = vshrl.u32 %v430_v21, 7 }
  0x62   :  { %872 = vmatprep.subr.bf16.mxu0 %v1058_v0 }
  0x65   :  { %873 = vmatpush3.bf16.msra.mxu0 %v914_v23  ;;  %v432_v23 = vsub.s32 0, %v431_v22 }
  0x66   :  { %874 = vmatprep.subr.bf16.mxu0 %v1058_v0 }
  0x69   :  { %875 = vmatpush3.bf16.msra.mxu0 %v915_v24  ;;  %v157_v24 = vld [vmem:[#allocation7 + $0x3] ss:$8 sm:$0x3] }
  0x6a   :  { %876 = vmatprep.subr.bf16.mxu0 %v1058_v0 }
  0x6d   :  { %877 = vmatpush3.bf16.msra.mxu0 %v916_v25  ;;  %v436_v25 = vsub.s32 1, %v431_v22 }
  0x6e   :  { %878 = vmatprep.subr.bf16.mxu0 %v1058_v0 }
  0x71   :  { %879 = vmatpush3.bf16.msra.mxu0 %v917_v34 }
  0x72   :  { %880 = vmatprep.subr.bf16.mxu0 %v1058_v0  ;;  %v946_v0 = vld [vmem:[#allocation5 + $0x210] ss:$8 sps:$4 sm:$0xff]  }
  0x75   :  { %881 = vmatpush3.bf16.msra.mxu0 %v918_v35 }
  0x76   :  { %804 = vmatprep.subr.bf16.mxu0 %v943_v61 }
 0x12b   :  { %v241_v27 = vpop.f32.mrb[0].mxu0 }
 0x12c   :  { %v242_v28 = vadd.f32 %v241_v27, %v153_v26  ;;  %v844_v29 = vpop.f32.mrb[1].mxu0  ;;  %v433_v26 = vrot.slane %v157_v24, %v432_v23  ;;  %v437_v27 = vrot.slane %v157_v24, %v436_v25 }
 0x12d   :  { %v244_v30 = vpop.f32.mrb[2].mxu0 }
 0x12e   :  { %v247_v31 = vmax.f32 %v242_v28, 0.0  ;;  %v845_v32 = vpop.f32.mrb[3].mxu0 }
 0x130   :  { %v248_v33 = vpack.c.bf16 %v247_v31, %v247_v31 }
 0x132   :  { %863 = vmatmul.mubr.bf16.vlgmr.msra.gmra.mrb[0].mxu1 %v248_v33 }
 0x133   :  { %521 = vmatpush1.bf16.msra.mxu1 %v919_v36  ;;  %552 = vmatprep.mubr.bf16.mxu1 %v1060_v60 }
 0x134   :  { %522 = vmatprep.subr.bf16.mxu1 %v924_v38 }
 0x137   :  { %523 = vmatpush1.bf16.msra.mxu1 %v922_v39  ;;  %v158_v39 = vld [vmem:[#allocation7 + $0x4] ss:$0 sm:$0xff] }
 0x138   :  { %524 = vmatprep.subr.bf16.mxu1 %v927_v40 }
 0x13b   :  { %525 = vmatpush1.bf16.msra.mxu1 %v925_v41 }
 0x13c   :  { %526 = vmatprep.subr.bf16.mxu1 %v930_v42 }
 0x13f   :  { %527 = vmatpush1.bf16.msra.mxu1 %v928_v43 }
 0x140   :  { %528 = vmatprep.subr.bf16.mxu1 %v933_v44 }
 0x143   :  { %529 = vmatpush1.bf16.msra.mxu1 %v931_v45 }
 0x144   :  { %530 = vmatprep.subr.bf16.mxu1 %v936_v46 }
 0x147   :  { %531 = vmatpush1.bf16.msra.mxu1 %v934_v47 }
 0x148   :  { %532 = vmatprep.subr.bf16.mxu1 %v939_v48 }
 0x14b   :  { %533 = vmatpush1.bf16.msra.mxu1 %v937_v49 }
 0x14c   :  { %534 = vmatprep.subr.bf16.mxu1 %v942_v58 }
 0x14f   :  { %535 = vmatpush1.bf16.msra.mxu1 %v940_v59 }
 0x205   :  { %v331_v51 = vpop.f32.mrb[0].mxu1 }
 0x206   :  { %v332_v52 = vadd.f32 %v331_v51, %v154_v50  ;;  %v864_v53 = vpop.f32.mrb[1].mxu1 }
 0x207   :  { %v334_v54 = vpop.f32.mrb[2].mxu1 }
 0x208   :  { %v337_v55 = vmax.f32 %v332_v52, 0.0  ;;  %v865_v56 = vpop.f32.mrb[3].mxu1 }
 0x20a   :  { %v338_v57 = vpack.c.bf16 %v337_v55, %v337_v55 }
 0x20c   :  { %883 = vmatmul.mubr.bf16.vlgmr.msra.gmra.mrb[4].mxu0 %v338_v57 }
 0x20d   :  { %805 = vmatpush3.bf16.msra.mxu0 %v944_v62 }
 0x20e   :  { %806 = vmatprep.subr.bf16.mxu0 %v945_v63 }
 0x211   :  { %807 = vmatpush3.bf16.msra.mxu0 %v946_v0 }
 0x212   :  { %808 = vmatprep.subr.bf16.mxu0 %v947_v1 }
 0x215   :  { %809 = vmatpush3.bf16.msra.mxu0 %v948_v2 }
 0x216   :  { %810 = vmatprep.subr.bf16.mxu0 %v949_v3 }
 0x219   :  { %811 = vmatpush3.bf16.msra.mxu0 %v950_v4 }
 0x21a   :  { %812 = vmatprep.subr.bf16.mxu0 %v951_v5 }
 0x21d   :  { %813 = vmatpush3.bf16.msra.mxu0 %v952_v6 }
 0x21e   :  { %814 = vmatprep.subr.bf16.mxu0 %v953_v7 }
 0x221   :  { %815 = vmatpush3.bf16.msra.mxu0 %v954_v8 }
 0x222   :  { %816 = vmatprep.subr.bf16.mxu0 %v955_v17 }
 0x225   :  { %817 = vmatpush3.bf16.msra.mxu0 %v956_v18 }
 0x226   :  { %818 = vmatprep.subr.bf16.mxu0 %v957_v19 }
 0x229   :  { %819 = vmatpush3.bf16.msra.mxu0 %v958_v20 }
 0x2df   :  { %v421_v10 = vpop.f32.mrb[4].mxu0 }
 0x2e0   :  { %v422_v11 = vadd.f32 %v421_v10, %v155_v9  ;;  %v884_v12 = vpop.f32.mrb[5].mxu0 }
 0x2e1   :  { %v424_v13 = vpop.f32.mrb[6].mxu0 }
 0x2e2   :  { %v427_v14 = vmax.f32 %v422_v11, 0.0  ;;  %v885_v15 = vpop.f32.mrb[7].mxu0 }
 0x2e4   :  { %v428_v16 = vpack.c.bf16 %v427_v14, %v427_v14 }
 0x2e6   :  { %553 = vmatmul.mubr.bf16.vlgmr.msra.gmra.mrb[4].mxu1 %v428_v16 }
 0x3b9   :  { %v554_v28 = vpop.f32.mrb[4].mxu1 }
 0x3ba   :  { %v555_v29 = vadd.f32 %v554_v28, %v433_v26  ;;  %v556_v30 = vpop.f32.mrb[5].mxu1 }
 0x3bb   :  { %v557_v31 = vadd.f32 %v556_v30, %v437_v27  ;;  %v558_v32 = vpop.f32.mrb[6].mxu1 }
 0x3bc   :  { %v561_v33 = vmax.f32 %v555_v29, 0.0  ;;  %v559_v34 = vpop.f32.mrb[7].mxu1 }
 0x3bd   :  { %v562_v35 = vmax.f32 %v557_v31, 0.0 }
 0x3be   :  { %v563_v37 = vpack.c.bf16 %v561_v33, %v561_v33 }
 0x3bf   :  { %v564_v36 = vpack.c.bf16 %v562_v35, %v562_v35 }
 0x3c1   :  { %693 = vmatprep.mubr.bf16.mxu0 %v564_v36 }
 0x3c2   :  { %694 = vmatmul.mubr.bf16.vlgmr.msra.gmra.mrb[8].mxu0 %v563_v37 }
 0x495   :  { %v820_v38 = vpop.f32.mrb[8].mxu0 }
 0x496   :  { %v821_v40 = vpop.f32.mrb[9].mxu0 }
 0x497   :  { %v822_v41 = vadd.f32 %v821_v40, %v820_v38  ;;  %v823_v42 = vpop.f32.mrb[10].mxu0 }
 0x498   :  { %v824_v43 = vpop.f32.mrb[11].mxu0 }
 0x499   :  { %v696_v44 = vadd.f32 %v822_v41, %v158_v39 }
 0x49b   :  { %701 = vst [vmem:[#allocation8] sm:$0xff] %v696_v44 }
 0x49c   :  { %1036 = shalt.err (!%p1033_p0)
}
 0x49d   :  { %s1037_s25 = scalar_lea.hbm %s1171_s3, 128 }
 0x49e   :  { %p1038_p1 = scmp.ne.s32.totalorder %s1171_s3, %s1037_s25  ;;  %p1041_p2 = scmp.lt.u32.totalorder %s1037_s25, %s1171_s3 }
 0x4a0   :  { %p1043_p3 = pnand %p1041_p2, %p1038_p1 }
 0x4a2   :  { %1046 = shalt.err (!%p1043_p3)
}
 0x4a3   :  { %711 = dma.vmem_to_hbm [thread:$0]  %s709_s21, 128, %s1171_s3, [#allocation4]  }
 0x4a4   :  { %1051 = dma.done.wait [#allocation4], 128  }
 0x4a5   :  { %1052 = vsyncadd [#allocation4], 4294967168 }
 0x4a6   :  { %715 = vsyncpa [#allocation3], 1 }
 0x4a7   :  { %716 = vsyncpa [#allocation6], 1 }
 0x4a8   :  { %717 = vsyncpa [#allocation4], 1 }

</bundles_post_ra>
